<compile_context>
chip_gen: v6e
topology: v6e:2x2x1
jax: 0.10.0
libtpu: 0.0.40
codegen_flags: <defaults>
</compile_context>

<pallas_src>
import numpy as np
import jax
import jax.numpy as jnp
from jax.experimental import pallas as pl
from jax.experimental.pallas import tpu as pltpu


def _act_fn(activation):
    if activation == 'relu':
        return lambda v: jnp.maximum(v, 0.0)
    if activation == 'tanh':
        return jnp.tanh
    if activation == 'sigmoid':
        return jax.nn.sigmoid
    raise ValueError('Invalid activation function')


def make_gffnn_kernel(activation, allow_negative_values):
    """Kernel closure. Ref order: x, bias_stack, w_0 ... w_L, out."""
    act = _act_fn(activation)

    def kernel(x_ref, b_ref, *w_and_out):
        out_ref = w_and_out[-1]
        w_refs = w_and_out[:-1]
        n = len(w_refs)

        h = x_ref[...]                                   # (tb, in_dim) f32
        for i, w_ref in enumerate(w_refs):
            w = w_ref[...]                               # (K, N) compute dtype
            width = w.shape[1]
            b = b_ref[i:i + 1, :][:, :width]             # (1, N) f32
            # bf16 (or f32) operands on the MXU, f32 accumulation.
            y = jnp.dot(h.astype(w.dtype), w,
                        preferred_element_type=jnp.float32) + b
            h = act(y) if i < n - 1 else y               # last layer: no activation
        if not allow_negative_values:
            h = jax.nn.sigmoid(h)
        out_ref[...] = h.astype(out_ref.dtype)

    return kernel


def preprocess_params(params, input_size, action_space_size, *, symmetric,
                      compute_dtype=jnp.bfloat16):
    """Fold GFFNN's symmetric machinery into the weights.

    params: list of (W, b) with W shaped (in, out), b shaped (out,).
    Returns (weights, bias_stack):
      weights:    list of (K_i, N_i) arrays cast to `compute_dtype`.
      bias_stack: (num_layers, max_N) f32, zero-padded.
    All transforms (sign flip, lane reversal, 0.5 scaling, zero padding) are
    exact in f32, so numerics match the unfused reference.
    """
    del action_space_size  # implied by the last layer's width
    ws = [jnp.asarray(w, jnp.float32) for (w, _) in params]
    bs = [jnp.asarray(b, jnp.float32).reshape(-1) for (_, b) in params]

    if symmetric:
        # x_ = cat(input * [-1, 1], reverse(q))  ==  exact row transform of W0.
        w0, b0 = ws[0], bs[0]
        w0_in_rows = jnp.concatenate([-w0[0:1, :], w0[1:2, :]], axis=0)
        w0_aug = jnp.concatenate([w0_in_rows, w0[input_size:, :][::-1, :]],
                                 axis=0)
        new_ws = [jnp.concatenate([w0, w0_aug], axis=1)]     # (in_dim, 2*H0)
        new_bs = [jnp.concatenate([b0, b0])]

        # Hidden layers: block-diagonal, lanes [H:2H] carry the x_ path.
        for w, b in zip(ws[1:-1], bs[1:-1]):
            z = jnp.zeros_like(w)
            new_ws.append(jnp.block([[w, z], [z, w]]))
            new_bs.append(jnp.concatenate([b, b]))

        # Final layer: fold torch.flip(..., dims=(1,)) and the 0.5 average.
        wl, bl = ws[-1], bs[-1]
        new_ws.append(jnp.concatenate([0.5 * wl, 0.5 * wl[:, ::-1]], axis=0))
        new_bs.append(0.5 * (bl + bl[::-1]))
        ws, bs = new_ws, new_bs

    ws = [w.astype(compute_dtype) for w in ws]
    max_w = max(int(w.shape[1]) for w in ws)
    bias_stack = np.zeros((len(ws), max_w), dtype=np.float32)
    for i, b in enumerate(bs):
        bias_stack[i, : b.shape[0]] = np.asarray(b)
    return ws, jnp.asarray(bias_stack)


def _pick_batch_tile(batch):
    """Batch tile: whole batch when small; otherwise a clean multiple of 8."""
    if batch <= 512:
        return batch
    for tb in (512, 256, 128, 64, 32, 16, 8):
        if batch % tb == 0:
            return tb
    return batch


def gffnn_forward(x_input, q_value, params, *, activation='relu',
                  symmetric=True, allow_negative_values=False,
                  compute_dtype=jnp.bfloat16):
    """params: list of (W, b) with W shaped (in, out), b shaped (out,)."""
    batch, input_size = x_input.shape
    action_space_size = q_value.shape[1]
    # The PyTorch module hard-codes the [[-1, 1]] sign mask => input_size == 2.
    assert input_size == 2, "GFFNN's [[-1, 1]] sign mask assumes input_size == 2"

    x = jnp.concatenate([x_input, q_value], axis=1).astype(jnp.float32)
    ws, bias_stack = preprocess_params(
        params, input_size, action_space_size,
        symmetric=symmetric, compute_dtype=compute_dtype)

    kernel = make_gffnn_kernel(activation, allow_negative_values)

    tb = _pick_batch_tile(batch)
    assert batch % tb == 0
    grid = (batch // tb,)
    in_dim = x.shape[1]

    in_specs = [pl.BlockSpec((tb, in_dim), lambda i: (i, 0)),          # x: batch-tiled
                pl.BlockSpec(bias_stack.shape, lambda i: (0, 0))]      # biases resident
    in_specs += [pl.BlockSpec(w.shape, lambda i: (0, 0)) for w in ws]  # weights resident
    out_specs = pl.BlockSpec((tb, action_space_size), lambda i: (i, 0))

    return pl.pallas_call(
        kernel,
        out_shape=jax.ShapeDtypeStruct((batch, action_space_size), jnp.float32),
        grid=grid,
        in_specs=in_specs,
        out_specs=out_specs,
        compiler_params=pltpu.CompilerParams(
            dimension_semantics=("parallel",)),  # batch tiles shard across TCs (v7x)
    )(x, bias_stack, *ws)


def gffnn_reference(x_input, q_value, params, *, activation='relu',
                    symmetric=True, allow_negative_values=False):
    """Pure-JAX reference mirroring the PyTorch forward exactly."""
    act = _act_fn(activation)
    sign = jnp.asarray([[-1.0, 1.0]], dtype=jnp.float32)
    x = jnp.concatenate([x_input, q_value], axis=1)
    x_ = jnp.concatenate([x_input * sign, q_value[:, ::-1]], axis=1)
    for (w, b) in params[:-1]:
        x = act(x @ w + b)
        x_ = act(x_ @ w + b)
    w, b = params[-1]
    q = x @ w + b
    if symmetric:
        q = (q + (x_ @ w + b)[:, ::-1]) / 2.0
    if not allow_negative_values:
        q = jax.nn.sigmoid(q)
    return q


def init_params(key, input_size, hidden_state_sizes, action_space_size):
    """Deterministic init matching nn.Linear shapes (weights stored as (in, out))."""
    in_dim = input_size + action_space_size
    dims = [in_dim] + list(hidden_state_sizes) + [action_space_size]
    params = []
    for fan_in, fan_out in zip(dims[:-1], dims[1:]):
        key, kw, kb = jax.random.split(key, 3)
        bound = 1.0 / np.sqrt(fan_in)
        w = jax.random.uniform(kw, (fan_in, fan_out), jnp.float32,
                               minval=-bound, maxval=bound)
        b = jax.random.uniform(kb, (fan_out,), jnp.float32,
                               minval=-bound, maxval=bound)
        params.append((w, b))
    return params


if __name__ == "__main__":
    # Configuration implied by the module's forward (2 input features because
    # of the [[-1, 1]] sign mask; action space of 2 so the flip matters).
    input_size = 2
    action_space_size = 2
    hidden_state_sizes = [32, 32]
    batch = 8

    key = jax.random.PRNGKey(0)
    key, k_in = jax.random.split(key)
    x_input = jax.random.normal(k_in, (batch, input_size), jnp.float32)
    q_value = 0.5 * jnp.ones((batch, action_space_size), jnp.float32)  # init_qvalue

    params = init_params(key, input_size, hidden_state_sizes, action_space_size)

    ref = gffnn_reference(x_input, q_value, params, activation='relu',
                          symmetric=True, allow_negative_values=False)
    ref = jax.block_until_ready(ref)

    # Structural check with f32 MXU operands (validates the weight folding).
    out_f32 = gffnn_forward(x_input, q_value, params, activation='relu',
                            symmetric=True, allow_negative_values=False,
                            compute_dtype=jnp.float32)
    out_f32 = jax.block_until_ready(out_f32)
    np.testing.assert_allclose(np.asarray(out_f32), np.asarray(ref),
                               rtol=2e-3, atol=2e-3)

    # Default fast path: bf16 MXU operands, f32 accumulation (looser tolerance).
    out_bf16 = gffnn_forward(x_input, q_value, params, activation='relu',
                             symmetric=True, allow_negative_values=False,
                             compute_dtype=jnp.bfloat16)
    out_bf16 = jax.block_until_ready(out_bf16)
    assert out_bf16.shape == (batch, action_space_size)
    np.testing.assert_allclose(np.asarray(out_bf16), np.asarray(ref),
                               rtol=2e-2, atol=2e-2)

    print("KERNEL_OK")
</pallas_src>

<mosaic_0001>
module attributes {stable_mosaic.version = 11 : i64} {
  func.func @kernel(%arg0: i32, %arg1: memref<8x4xf32, #tpu.memory_space<vmem>>, %arg2: memref<3x64xf32, #tpu.memory_space<vmem>>, %arg3: memref<4x64xf32, #tpu.memory_space<vmem>>, %arg4: memref<64x64xf32, #tpu.memory_space<vmem>>, %arg5: memref<64x2xf32, #tpu.memory_space<vmem>>, %arg6: memref<8x2xf32, #tpu.memory_space<vmem>>) attributes {dimension_semantics = [#tpu.dimension_semantics<parallel>], iteration_bounds = array<i64: 1>, scalar_prefetch = 0 : i64, scratch_operands = 0 : i64, tpu.core_type = #tpu.core_type<tc>, window_params = [{transform_indices = @transform_0, window_bounds = array<i64: 8, 4>}, {pipeline_mode = #tpu.pipeline_mode<synchronous>, transform_indices = @transform_1, window_bounds = array<i64: 3, 64>}, {pipeline_mode = #tpu.pipeline_mode<synchronous>, transform_indices = @transform_2, window_bounds = array<i64: 4, 64>}, {pipeline_mode = #tpu.pipeline_mode<synchronous>, transform_indices = @transform_3, window_bounds = array<i64: 64, 64>}, {pipeline_mode = #tpu.pipeline_mode<synchronous>, transform_indices = @transform_4, window_bounds = array<i64: 64, 2>}, {transform_indices = @transform_5, window_bounds = array<i64: 8, 2>}]} {
    %c0 = arith.constant 0 : index
    %c0_0 = arith.constant 0 : index
    %0 = vector.load %arg1[%c0, %c0_0] : memref<8x4xf32, #tpu.memory_space<vmem>>, vector<8x4xf32>
    %c0_1 = arith.constant 0 : index
    %c0_2 = arith.constant 0 : index
    %1 = vector.load %arg3[%c0_1, %c0_2] : memref<4x64xf32, #tpu.memory_space<vmem>>, vector<4x64xf32>
    %c0_3 = arith.constant 0 : index
    %c0_4 = arith.constant 0 : index
    %2 = vector.load %arg2[%c0_3, %c0_4] : memref<3x64xf32, #tpu.memory_space<vmem>>, vector<1x64xf32>
    %cst = arith.constant dense<0.000000e+00> : vector<8x64xf32>
    %3 = tpu.matmul %0, %1, %cst {dimension_numbers = #tpu.dot_dimension_numbers<[1], [0], [0], [1], [0, 0, 1, 1], [], []>} : vector<8x4xf32>, vector<4x64xf32>, vector<8x64xf32> -> vector<8x64xf32>
    %4 = vector.broadcast %2 : vector<1x64xf32> to vector<8x64xf32>
    %5 = arith.addf %3, %4 : vector<8x64xf32>
    %cst_5 = arith.constant 0.000000e+00 : f32
    %6 = vector.broadcast %cst_5 : f32 to vector<8x64xf32>
    %7 = arith.maximumf %5, %6 : vector<8x64xf32>
    %c0_6 = arith.constant 0 : index
    %c0_7 = arith.constant 0 : index
    %8 = vector.load %arg4[%c0_6, %c0_7] : memref<64x64xf32, #tpu.memory_space<vmem>>, vector<64x64xf32>
    %c1 = arith.constant 1 : index
    %c0_8 = arith.constant 0 : index
    %9 = vector.load %arg2[%c1, %c0_8] : memref<3x64xf32, #tpu.memory_space<vmem>>, vector<1x64xf32>
    %cst_9 = arith.constant dense<0.000000e+00> : vector<8x64xf32>
    %10 = tpu.matmul %7, %8, %cst_9 {dimension_numbers = #tpu.dot_dimension_numbers<[1], [0], [0], [1], [0, 0, 1, 1], [], []>} : vector<8x64xf32>, vector<64x64xf32>, vector<8x64xf32> -> vector<8x64xf32>
    %11 = vector.broadcast %9 : vector<1x64xf32> to vector<8x64xf32>
    %12 = arith.addf %10, %11 : vector<8x64xf32>
    %cst_10 = arith.constant 0.000000e+00 : f32
    %13 = vector.broadcast %cst_10 : f32 to vector<8x64xf32>
    %14 = arith.maximumf %12, %13 : vector<8x64xf32>
    %c0_11 = arith.constant 0 : index
    %c0_12 = arith.constant 0 : index
    %15 = vector.load %arg5[%c0_11, %c0_12] : memref<64x2xf32, #tpu.memory_space<vmem>>, vector<64x2xf32>
    %c2 = arith.constant 2 : index
    %c0_13 = arith.constant 0 : index
    %16 = vector.load %arg2[%c2, %c0_13] : memref<3x64xf32, #tpu.memory_space<vmem>>, vector<1x64xf32>
    %17 = vector.extract_strided_slice %16 {offsets = [0, 0], sizes = [1, 2], strides = [1, 1]} : vector<1x64xf32> to vector<1x2xf32>
    %cst_14 = arith.constant dense<0.000000e+00> : vector<8x2xf32>
    %18 = tpu.matmul %14, %15, %cst_14 {dimension_numbers = #tpu.dot_dimension_numbers<[1], [0], [0], [1], [0, 0, 1, 1], [], []>} : vector<8x64xf32>, vector<64x2xf32>, vector<8x2xf32> -> vector<8x2xf32>
    %19 = vector.broadcast %17 : vector<1x2xf32> to vector<8x2xf32>
    %20 = arith.addf %18, %19 : vector<8x2xf32>
    %21 = arith.negf %20 : vector<8x2xf32>
    %22 = math.exp %21 : vector<8x2xf32>
    %cst_15 = arith.constant 1.000000e+00 : f32
    %23 = vector.broadcast %cst_15 : f32 to vector<8x2xf32>
    %24 = arith.addf %23, %22 : vector<8x2xf32>
    %25 = arith.divf %23, %24 : vector<8x2xf32>
    %c0_16 = arith.constant 0 : index
    %c0_17 = arith.constant 0 : index
    %26 = vector.load %arg6[%c0_16, %c0_17] : memref<8x2xf32, #tpu.memory_space<vmem>>, vector<8x2xf32>
    tpu.vector_store %arg6[%c0_16, %c0_17], %25 {strides = array<i32>} : memref<8x2xf32, #tpu.memory_space<vmem>>, vector<8x2xf32>,
    return
  }
  func.func @transform_0(%arg0: i32) -> (i32, i32) {
    %c0_i32 = arith.constant 0 : i32
    %c0_i32_0 = arith.constant 0 : i32
    return %arg0, %c0_i32 : i32, i32
  }
  func.func @transform_1(%arg0: i32) -> (i32, i32) {
    %c0_i32 = arith.constant 0 : i32
    %c0_i32_0 = arith.constant 0 : i32
    %c0_i32_1 = arith.constant 0 : i32
    return %c0_i32, %c0_i32_0 : i32, i32
  }
  func.func @transform_2(%arg0: i32) -> (i32, i32) {
    %c0_i32 = arith.constant 0 : i32
    %c0_i32_0 = arith.constant 0 : i32
    %c0_i32_1 = arith.constant 0 : i32
    return %c0_i32, %c0_i32_0 : i32, i32
  }
  func.func @transform_3(%arg0: i32) -> (i32, i32) {
    %c0_i32 = arith.constant 0 : i32
    %c0_i32_0 = arith.constant 0 : i32
    %c0_i32_1 = arith.constant 0 : i32
    return %c0_i32, %c0_i32_0 : i32, i32
  }
  func.func @transform_4(%arg0: i32) -> (i32, i32) {
    %c0_i32 = arith.constant 0 : i32
    %c0_i32_0 = arith.constant 0 : i32
    %c0_i32_1 = arith.constant 0 : i32
    return %c0_i32, %c0_i32_0 : i32, i32
  }
  func.func @transform_5(%arg0: i32) -> (i32, i32) {
    %c0_i32 = arith.constant 0 : i32
    %c0_i32_0 = arith.constant 0 : i32
    return %arg0, %c0_i32 : i32, i32
  }
}

</mosaic_0001>

<bundles_post_ra>
// kernel: tpu_custom_call.1
= control target key start
LH: loop header
LB: loop body
LE: loop exit
PB: predicated region body
PF: predicated region fallthrough
CT: control target
= control target key end

     0   :  { %vm31_vm0 = vcmask 1043456   ;;  %vm27_vm1 = vcmask 31744   ;;  %v369_v0 = vmov 0.0   ;;  %vm370_vm2 = vmmov 0   ;;  %s492_s2 = inlined_call_operand.vmem [shape: f32[4,64], index: 2, kind: input, shape index: {}]   ;;  %s493_s0 = inlined_call_operand.vmem [shape: f32[8,4], index: 0, kind: input, shape index: {}]   ;;  %s494_s3 = inlined_call_operand.vmem [shape: f32[64,64], index: 3, kind: input, shape index: {}]   ;;  %s495_s4 = inlined_call_operand.vmem [shape: f32[64,2], index: 4, kind: input, shape index: {}]   ;;  %s496_s1 = inlined_call_operand.vmem [shape: f32[3,64], index: 1, kind: input, shape index: {}]   ;;  %s497_s5 = inlined_call_operand.vmem [shape: f32[8,2], index: 5, kind: output, shape index: {}]  }
   0x1   :  { %320 = vmatprep.subr.mxu0 %v369_v0  ;;  %v21_v1 = vld [vmem:[%s492_s2] sm:$0xf]  ;;  %322 = vmatprep.mubr.msk.f32.mxu0 %vm370_vm2, %v369_v0  ;;  %v113_v3 = vld [vmem:[%s494_s3 + $0x38] sm:$0xff]  ;;  %v112_v4 = vld [vmem:[%s494_s3 + $0x30] sm:$0xff]  ;;  %vm119_vm3 = vcmask 523264   ;;  %vm286_vm4 = vcmask 15360  }
   0x2   :  { %v20_v2 = vld [vmem:[%s493_s0] sm:$0xff]  ;;  %321 = vmatpush3.msk.msra.mxu0 %vm31_vm0, %v21_v1  ;;  %325 = vmatprep.subr.mxu1 %v369_v0  ;;  %v111_v5 = vld [vmem:[%s494_s3 + $0x28] sm:$0xff]  ;;  %v109_v7 = vld [vmem:[%s494_s3 + $0x18] sm:$0xff] }
   0x3   :  { %323 = vmatmul.mubr.msk.f32.vlgmr.msra.gmra.mxu0 %vm27_vm1, %v20_v2  ;;  %326 = vmatpush3.msra.mxu1 %v113_v3  ;;  %v110_v6 = vld [vmem:[%s494_s3 + $0x20] sm:$0xff]  ;;  %v108_v8 = vld [vmem:[%s494_s3 + $0x10] sm:$0xff]  ;;  %v107_v9 = vld [vmem:[%s494_s3 + $0x8] sm:$0xff] }
   0x4   :  { %327 = vmatprep.subr.mxu1 %v369_v0  ;;  %341 = vmatprep.mubr.msk.f32.mxu1 %vm370_vm2, %v369_v0  ;;  %v106_v10 = vld [vmem:[%s494_s3] sm:$0xff]  ;;  %v201_v11 = vld [vmem:[%s495_s4 + $0x38] sm:$0xff]  ;;  %v200_v12 = vld [vmem:[%s495_s4 + $0x30] sm:$0xff] }
   0x5   :  { %328 = vmatpush3.msra.mxu1 %v112_v4  ;;  %344 = vmatprep.subr.mxu0 %v369_v0  ;;  %v199_v13 = vld [vmem:[%s495_s4 + $0x28] sm:$0xff]  ;;  %v198_v14 = vld [vmem:[%s495_s4 + $0x20] sm:$0xff]  ;;  %v197_v15 = vld [vmem:[%s495_s4 + $0x18] sm:$0xff] }
   0x6   :  { %329 = vmatprep.subr.mxu1 %v369_v0  ;;  %360 = vmatprep.mubr.msk.f32.mxu0 %vm370_vm2, %v369_v0  ;;  %v292_v16 = vld [vmem:[%s496_s1] ss:$0 sm:$0xff]  ;;  %v196_v21 = vld [vmem:[%s495_s4 + $0x10] sm:$0xff]  ;;  %v195_v22 = vld [vmem:[%s495_s4 + $0x8] sm:$0xff] }
   0x7   :  { %330 = vmatpush3.msra.mxu1 %v111_v5  ;;  %345 = vmatpush3.msra.mxu0 %v201_v11  ;;  %v194_v23 = vld [vmem:[%s495_s4] sm:$0xff] }
   0x8   :  { %331 = vmatprep.subr.mxu1 %v369_v0  ;;  %346 = vmatprep.subr.mxu0 %v369_v0  ;;  %v295_v24 = vld [vmem:[%s496_s1 + $0x1] ss:$0 sm:$0xff]  ;;  %v297_v29 = vld [vmem:[%s496_s1 + $0x2] ss:$0 sm:$0xff] }
   0x9   :  { %332 = vmatpush3.msra.mxu1 %v110_v6  ;;  %347 = vmatpush3.msra.mxu0 %v200_v12 }
   0xa   :  { %333 = vmatprep.subr.mxu1 %v369_v0  ;;  %348 = vmatprep.subr.mxu0 %v369_v0 }
   0xb   :  { %334 = vmatpush3.msra.mxu1 %v109_v7  ;;  %349 = vmatpush3.msra.mxu0 %v199_v13 }
   0xc   :  { %335 = vmatprep.subr.mxu1 %v369_v0  ;;  %350 = vmatprep.subr.mxu0 %v369_v0 }
   0xd   :  { %336 = vmatpush3.msra.mxu1 %v108_v8  ;;  %351 = vmatpush3.msra.mxu0 %v198_v14 }
   0xe   :  { %337 = vmatprep.subr.mxu1 %v369_v0  ;;  %352 = vmatprep.subr.mxu0 %v369_v0 }
   0xf   :  { %338 = vmatpush3.msra.mxu1 %v107_v9  ;;  %353 = vmatpush3.msra.mxu0 %v197_v15 }
  0x10   :  { %339 = vmatprep.subr.mxu1 %v369_v0  ;;  %354 = vmatprep.subr.mxu0 %v369_v0 }
  0x11   :  { %340 = vmatpush3.msra.mxu1 %v106_v10  ;;  %355 = vmatpush3.msra.mxu0 %v196_v21 }
  0x12   :  { %356 = vmatprep.subr.mxu0 %v369_v0 }
  0x13   :  { %357 = vmatpush3.msra.mxu0 %v195_v22 }
  0x14   :  { %358 = vmatprep.subr.mxu0 %v369_v0 }
  0x15   :  { %359 = vmatpush3.msra.mxu0 %v194_v23 }
  0xc3   :  { %v101_v17 = vpop.f32.mrf.mxu0 }
  0xc4   :  { %v102_v18 = vadd.f32 %v292_v16, %v101_v17 }
  0xc5   :  { %v324_v19 = vpop.f32.mrf.mxu0 }
  0xc6   :  { %v105_v20 = vmax.f32 %v102_v18, 0.0 }
  0xc8   :  { %342 = vmatmul.mubr.msk.f32.vlgmr.msra.gmra.mxu1 %vm119_vm3, %v105_v20 }
 0x188   :  { %v189_v25 = vpop.f32.mrf.mxu1 }
 0x189   :  { %v190_v26 = vadd.f32 %v295_v24, %v189_v25 }
 0x18a   :  { %v343_v27 = vpop.f32.mrf.mxu1 }
 0x18b   :  { %v193_v28 = vmax.f32 %v190_v26, 0.0 }
 0x18d   :  { %361 = vmatmul.mubr.msk.f32.vlgmr.msra.gmra.mxu0 %vm119_vm3, %v193_v28 }
 0x24d   :  { %v276_v30 = vpop.f32.mrf.mxu0 }
 0x24e   :  { %v277_v31 = vadd.f32 %v297_v29, %v276_v30 }
 0x24f   :  { %v362_v32 = vpop.f32.mrf.mxu0 }
 0x250   :  { %v299_v33 = vmul.f32 -1.442695, %v277_v31 }
 0x252   :  { %365 = vpow2.f32 %v299_v33 }
 0x25f   :  { %v366_v34 = vpop.eup %365 }
 0x260   :  { %v283_v35 = vadd.f32 1.0, %v366_v34 }
 0x262   :  { %367 = vrcp.f32 %v283_v35 }
 0x26f   :  { %v368_v36 = vpop.eup %367 }
 0x270   :  { %287 = vst.msk [vmem:[%s497_s5] sm:$0xff] %vm286_vm4, %v368_v36 }

</bundles_post_ra>
